<compile_context>
chip_gen: v7x
topology: tpu7x:2x2x1
jax: 0.10.0
libtpu: 0.0.40
codegen_flags: <defaults>
</compile_context>

<pallas_src>
import jax
import jax.numpy as jnp
from jax import lax
from jax.experimental import pallas as pl
from jax.experimental.pallas import tpu as pltpu


def _round_up(x, m):
    return (x + m - 1) // m * m


def _cc_head_kernel(scale_ref, x_ref, wt_ref, o_ref):
    # scale_ref: (1,) f32 in SMEM
    # x_ref:     (tile_n, HW, C) f32   (channels-last feature tile)
    # wt_ref:    (C, tile_out)   f32   (pre-transposed weight tile)
    # o_ref:     (tile_n, tile_out) f32
    x = x_ref[...]
    wt = wt_ref[...]

    # adaptive average pool over the flattened spatial axis -> (tile_n, C)
    pooled = jnp.mean(x, axis=1)

    # Unnormalized cosine numerator on the MXU (no operand transpose needed).
    cos_raw = jnp.dot(pooled, wt, preferred_element_type=jnp.float32)

    # Row / column sums of squares for the L2 norms.
    x_sumsq = jnp.sum(pooled * pooled, axis=1, keepdims=True)   # (tile_n, 1)
    w_sumsq = jnp.sum(wt * wt, axis=0, keepdims=True)           # (1, tile_out)

    # F.normalize(., eps=1e-12):  1/max(sqrt(s),1e-12) == rsqrt(max(s,1e-24)).
    # Fold scale_cls into the per-row feature factor (EUP rsqrt; cheap).
    x_scale = scale_ref[0] * lax.rsqrt(jnp.maximum(x_sumsq, 1e-24))
    w_scale = lax.rsqrt(jnp.maximum(w_sumsq, 1e-24))

    o_ref[...] = cos_raw * x_scale * w_scale


def cc_head_forward(features, weight, scale_cls):
    """features: (N, C, H, W) or (N, C); weight: (outdim, C); scale_cls: scalar."""
    features = jnp.asarray(features, jnp.float32)
    weight = jnp.asarray(weight, jnp.float32)

    if features.ndim == 4:
        n, c, h, w = features.shape
        hw = h * w
        # channels-last so C maps to the 128-lane axis inside the kernel.
        x3 = jnp.transpose(features.reshape(n, c, hw), (0, 2, 1))   # (N, HW, C)
    elif features.ndim == 2:
        n, c = features.shape
        hw = 1
        x3 = features.reshape(n, 1, c)          # mean over size-1 axis == identity
    else:
        raise ValueError("features must be 2-D or 4-D")

    outdim, c_w = weight.shape
    assert c_w == c, "weight in-dim must match feature channels"

    # Pre-transpose the weight: (C, outdim) feeds the MXU with no in-kernel .T
    w_t = weight.T

    # --- tile sizing against a conservative per-buffer VMEM budget ------------
    # (double-buffered inputs; fits v7x's 64 MiB physical / 32 MiB scoped VMEM)
    feat_budget = 4 * 1024 * 1024     # bytes per feature buffer
    w_budget = 2 * 1024 * 1024        # bytes per weight buffer

    tile_out = 128
    for cand in (512, 256, 128):
        if cand * c * 4 <= w_budget:
            tile_out = cand
            break
    tile_out = min(tile_out, _round_up(outdim, 128))   # lane-dense (>=128)

    tile_n = 8
    for cand in (256, 128, 64, 32, 16, 8):
        if cand * hw * c * 4 <= feat_budget:
            tile_n = cand
            break
    tile_n = min(tile_n, _round_up(n, 8))

    n_pad = _round_up(n, tile_n)
    out_pad = _round_up(outdim, tile_out)

    if n_pad != n:
        x3 = jnp.pad(x3, ((0, n_pad - n), (0, 0), (0, 0)))
    if out_pad != outdim:
        w_t = jnp.pad(w_t, ((0, 0), (0, out_pad - outdim)))

    grid = (n_pad // tile_n, out_pad // tile_out)
    scale = jnp.asarray(scale_cls, jnp.float32).reshape((1,))

    # Advisory cost hint (mem-bound kernel; feature block reused across the
    # inner outdim axis, weight re-fetched per N tile).
    cost = pl.CostEstimate(
        flops=2 * n_pad * out_pad * c + n_pad * hw * c + 2 * n_pad * out_pad,
        transcendentals=n_pad * grid[1] + out_pad * grid[0],
        bytes_accessed=(n_pad * hw * c + grid[0] * out_pad * c
                        + n_pad * out_pad) * 4,
    )

    out = pl.pallas_call(
        _cc_head_kernel,
        out_shape=jax.ShapeDtypeStruct((n_pad, out_pad), jnp.float32),
        grid_spec=pltpu.PrefetchScalarGridSpec(
            num_scalar_prefetch=0,
            grid=grid,                              # (N tiles, outdim tiles)
            in_specs=[
                pl.BlockSpec(memory_space=pltpu.SMEM),                   # scale
                pl.BlockSpec((tile_n, hw, c), lambda i, j: (i, 0, 0)),   # features
                pl.BlockSpec((c, tile_out), lambda i, j: (0, j)),        # weight.T
            ],
            out_specs=pl.BlockSpec((tile_n, tile_out), lambda i, j: (i, j)),
        ),
        compiler_params=pltpu.CompilerParams(
            dimension_semantics=("parallel", "parallel"),
            vmem_limit_bytes=48 * 1024 * 1024,
        ),
        cost_estimate=cost,
    )(scale, x3, w_t)

    return out[:n, :outdim]


def _reference(features, weight, scale_cls):
    f = jnp.asarray(features, jnp.float32)
    if f.ndim == 4:
        f = jnp.mean(f, axis=(2, 3))
    xn = f / jnp.maximum(jnp.linalg.norm(f, axis=1, keepdims=True), 1e-12)
    wn = weight / jnp.maximum(jnp.linalg.norm(weight, axis=1, keepdims=True), 1e-12)
    return scale_cls * (xn @ wn.T)


if __name__ == "__main__":
    # Deterministic synthetic setup (no checkpoint loading).
    key = jax.random.PRNGKey(0)
    k_x, k_w = jax.random.split(key)

    batch, indim, spatial, outdim = 4, 32, 8, 16
    scale_cls = 10.0

    x = jax.random.normal(k_x, (batch, indim, spatial, spatial), dtype=jnp.float32)
    # nn.Linear-style deterministic init for the (outdim, indim) weight.
    w = jax.random.uniform(k_w, (outdim, indim), dtype=jnp.float32,
                           minval=-1.0 / jnp.sqrt(indim), maxval=1.0 / jnp.sqrt(indim))

    out = cc_head_forward(x, w, scale_cls)
    out = jax.block_until_ready(out)

    ref = _reference(x, w, scale_cls)
    assert out.shape == (batch, outdim)
    assert jnp.allclose(out, ref, atol=1e-3, rtol=1e-3)

    print("KERNEL_OK")
</pallas_src>

<mosaic_0001>
module attributes {stable_mosaic.version = 11 : i64} {
  func.func @_cc_head_kernel(%arg0: i32, %arg1: i32, %arg2: memref<1xf32, #tpu.memory_space<smem>>, %arg3: memref<8x64x32xf32, #tpu.memory_space<vmem>>, %arg4: memref<32x128xf32, #tpu.memory_space<vmem>>, %arg5: memref<8x128xf32, #tpu.memory_space<vmem>>) attributes {dimension_semantics = [#tpu.dimension_semantics<parallel>, #tpu.dimension_semantics<parallel>], iteration_bounds = array<i64: 1, 1>, scalar_prefetch = 0 : i64, scratch_operands = 0 : i64, tpu.core_type = #tpu.core_type<tc>, window_params = [{transform_indices = @transform_0, window_bounds = array<i64: 1>}, {transform_indices = @transform_1, window_bounds = array<i64: 8, 64, 32>}, {transform_indices = @transform_2, window_bounds = array<i64: 32, 128>}, {transform_indices = @transform_3, window_bounds = array<i64: 8, 128>}]} {
    %c0 = arith.constant 0 : index
    %c0_0 = arith.constant 0 : index
    %c0_1 = arith.constant 0 : index
    %0 = vector.load %arg3[%c0, %c0_0, %c0_1] : memref<8x64x32xf32, #tpu.memory_space<vmem>>, vector<8x64x32xf32>
    %c0_2 = arith.constant 0 : index
    %c0_3 = arith.constant 0 : index
    %1 = vector.load %arg4[%c0_2, %c0_3] : memref<32x128xf32, #tpu.memory_space<vmem>>, vector<32x128xf32>
    %cst = arith.constant dense<0.000000e+00> : vector<8x32xf32>
    %2 = vector.multi_reduction <add>, %0, %cst [1] : vector<8x64x32xf32> to vector<8x32xf32>
    %cst_4 = arith.constant 6.400000e+01 : f32
    %3 = vector.broadcast %cst_4 : f32 to vector<8x32xf32>
    %4 = arith.divf %2, %3 : vector<8x32xf32>
    %cst_5 = arith.constant dense<0.000000e+00> : vector<8x128xf32>
    %5 = tpu.matmul %4, %1, %cst_5 {dimension_numbers = #tpu.dot_dimension_numbers<[1], [0], [0], [1], [0, 0, 1, 1], [], []>} : vector<8x32xf32>, vector<32x128xf32>, vector<8x128xf32> -> vector<8x128xf32>
    %6 = arith.mulf %4, %4 : vector<8x32xf32>
    %cst_6 = arith.constant dense<0.000000e+00> : vector<8xf32>
    %7 = vector.multi_reduction <add>, %6, %cst_6 [1] : vector<8x32xf32> to vector<8xf32>
    %8 = vector.shape_cast %7 : vector<8xf32> to vector<8x1xf32>
    %9 = arith.mulf %1, %1 : vector<32x128xf32>
    %cst_7 = arith.constant dense<0.000000e+00> : vector<128xf32>
    %10 = vector.multi_reduction <add>, %9, %cst_7 [0] : vector<32x128xf32> to vector<128xf32>
    %11 = vector.shape_cast %10 : vector<128xf32> to vector<1x128xf32>
    %c0_8 = arith.constant 0 : index
    %12 = memref.load %arg2[%c0_8] : memref<1xf32, #tpu.memory_space<smem>>
    %cst_9 = arith.constant 1.000000e-24 : f32
    %13 = vector.broadcast %cst_9 : f32 to vector<8x1xf32>
    %14 = arith.maximumf %8, %13 : vector<8x1xf32>
    %15 = math.rsqrt %14 : vector<8x1xf32>
    %16 = vector.broadcast %12 : f32 to vector<8x1xf32>
    %17 = arith.mulf %16, %15 : vector<8x1xf32>
    %cst_10 = arith.constant 1.000000e-24 : f32
    %18 = vector.broadcast %cst_10 : f32 to vector<1x128xf32>
    %19 = arith.maximumf %11, %18 : vector<1x128xf32>
    %20 = math.rsqrt %19 : vector<1x128xf32>
    %21 = vector.broadcast %17 : vector<8x1xf32> to vector<8x128xf32>
    %22 = arith.mulf %5, %21 : vector<8x128xf32>
    %23 = vector.broadcast %20 : vector<1x128xf32> to vector<8x128xf32>
    %24 = arith.mulf %22, %23 : vector<8x128xf32>
    %c0_11 = arith.constant 0 : index
    %c0_12 = arith.constant 0 : index
    %25 = vector.load %arg5[%c0_11, %c0_12] : memref<8x128xf32, #tpu.memory_space<vmem>>, vector<8x128xf32>
    tpu.vector_store %arg5[%c0_11, %c0_12], %24 {strides = array<i32>} : memref<8x128xf32, #tpu.memory_space<vmem>>, vector<8x128xf32>,
    return
  }
  func.func @transform_0(%arg0: i32, %arg1: i32) -> i32 {
    %c0_i32 = arith.constant 0 : i32
    %c0_i32_0 = arith.constant 0 : i32
    return %c0_i32 : i32
  }
  func.func @transform_1(%arg0: i32, %arg1: i32) -> (i32, i32, i32) {
    %c0_i32 = arith.constant 0 : i32
    %c0_i32_0 = arith.constant 0 : i32
    %c0_i32_1 = arith.constant 0 : i32
    return %arg0, %c0_i32, %c0_i32_0 : i32, i32, i32
  }
  func.func @transform_2(%arg0: i32, %arg1: i32) -> (i32, i32) {
    %c0_i32 = arith.constant 0 : i32
    %c0_i32_0 = arith.constant 0 : i32
    return %c0_i32, %arg1 : i32, i32
  }
  func.func @transform_3(%arg0: i32, %arg1: i32) -> (i32, i32) {
    %c0_i32 = arith.constant 0 : i32
    return %arg0, %arg1 : i32, i32
  }
}

</mosaic_0001>

<bundles_post_ra>
// kernel: tpu_custom_call.1
= control target key start
LH: loop header
LB: loop body
LE: loop exit
PB: predicated region body
PF: predicated region fallthrough
CT: control target
= control target key end

     0   :  { %v475_v3 = vmov 0.0|0.0   ;;  %vm476_vm0 = vmmov 0   ;;  %v477_v13 = vmov 0.0   ;;  %vm84_vm1 = vcmask 261120   ;;  %s792_s0 = inlined_call_operand.<no memory space> [shape: f32[1], index: 0, kind: input, shape index: {}]   ;;  %s793_s1 = inlined_call_operand.vmem [shape: f32[8,64,32], index: 1, kind: input, shape index: {}]   ;;  %s794_s2 = inlined_call_operand.vmem [shape: f32[32,128], index: 2, kind: input, shape index: {}]   ;;  %s795_s3 = inlined_call_operand.hbm [shape: f32[8,128], index: 3, kind: output, shape index: {}]  }
   0x1   :  { %v80_v0 = vld [vmem:[%s794_s2] sm:$0xff]  ;;  %v81_v1 = vld [vmem:[%s794_s2 + $0x8] sm:$0xff]  ;;  %v82_v2 = vld [vmem:[%s794_s2 + $0x10] sm:$0xff]  ;;  %437 = vmatprep.subr.bf16.mxu0 %v475_v3  ;;  %434 = vmatprep.mubr.msk.f32.mxu0 %vm476_vm0, %v477_v13 }
   0x2   :  { %v438_v4 = vpack.c.bf16 %v81_v1, %v80_v0  ;;  %v383_v5 = vmul.f32 %v80_v0, %v80_v0  ;;  %v384_v6 = vmul.f32 %v81_v1, %v81_v1  ;;  %v83_v7 = vld [vmem:[%s794_s2 + $0x18] sm:$0xff]  ;;  %v385_v8 = vmul.f32 %v82_v2, %v82_v2  ;;  %v16_v9 = vld [vmem:[%s793_s1] sm:$0xff]  ;;  %v17_v10 = vld [vmem:[%s793_s1 + $0x8] sm:$0xff] }
   0x3   :  { %v441_v11 = vpack.c.bf16 %v83_v7, %v82_v2  ;;  %v386_v12 = vmul.f32 %v83_v7, %v83_v7  ;;  %v18_v14 = vld [vmem:[%s793_s1 + $0x10] sm:$0xff]  ;;  %v19_v15 = vld [vmem:[%s793_s1 + $0x18] sm:$0xff]  ;;  %v20_v17 = vld [vmem:[%s793_s1 + $0x20] sm:$0xff]  ;;  %v85_v18 = vsel %vm84_vm1, %v16_v9, 0.0  ;;  %v86_v19 = vsel %vm84_vm1, %v17_v10, 0.0 }
   0x4   :  { %439 = vmatpush3.bf16.msra.mxu0 %v438_v4  ;;  %v387_v16 = vadd.f32 %v384_v6, %v383_v5  ;;  %v88_v20 = vsel %vm84_vm1, %v18_v14, 0.0  ;;  %v24_v21 = vld [vmem:[%s793_s1 + $0x40] sm:$0xff]  ;;  %v25_v22 = vld [vmem:[%s793_s1 + $0x48] sm:$0xff]  ;;  %v26_v23 = vld [vmem:[%s793_s1 + $0x50] sm:$0xff]  ;;  %v87_v24 = vadd.f32 %v86_v19, %v85_v18  ;;  %v90_v27 = vsel %vm84_vm1, %v19_v15, 0.0 }
   0x5   :  { %440 = vmatprep.subr.bf16.mxu0 %v475_v3  ;;  %v27_v26 = vld [vmem:[%s793_s1 + $0x58] sm:$0xff]  ;;  %v106_v28 = vsel %vm84_vm1, %v24_v21, 0.0  ;;  %v21_v29 = vld [vmem:[%s793_s1 + $0x28] sm:$0xff]  ;;  %v32_v30 = vld [vmem:[%s793_s1 + $0x80] sm:$0xff]  ;;  %v107_v32 = vsel %vm84_vm1, %v25_v22, 0.0  ;;  %v109_v33 = vsel %vm84_vm1, %v26_v23, 0.0 }
   0x6   :  { %v388_v25 = vadd.f32 %v387_v16, %v385_v8  ;;  %v89_v31 = vadd.f32 %v88_v20, %v87_v24  ;;  %v28_v35 = vld [vmem:[%s793_s1 + $0x60] sm:$0xff]  ;;  %v33_v36 = vld [vmem:[%s793_s1 + $0x88] sm:$0xff]  ;;  %v34_v37 = vld [vmem:[%s793_s1 + $0x90] sm:$0xff]  ;;  %v92_v38 = vsel %vm84_vm1, %v20_v17, 0.0  ;;  %v108_v39 = vadd.f32 %v107_v32, %v106_v28 }
   0x7   :  { %v22_v40 = vld [vmem:[%s793_s1 + $0x30] sm:$0xff]  ;;  %v23_v41 = vld [vmem:[%s793_s1 + $0x38] sm:$0xff]  ;;  %v111_v44 = vsel %vm84_vm1, %v27_v26, 0.0  ;;  %v127_v45 = vsel %vm84_vm1, %v32_v30, 0.0  ;;  %v29_v46 = vld [vmem:[%s793_s1 + $0x68] sm:$0xff]  ;;  %v94_v48 = vsel %vm84_vm1, %v21_v29, 0.0 }
   0x8   :  { %442 = vmatpush3.bf16.msra.mxu0 %v441_v11  ;;  %v551_v34 = vadd.f32 %v388_v25, %v386_v12  ;;  %v35_v42 = vld [vmem:[%s793_s1 + $0x98] sm:$0xff]  ;;  %v91_v43 = vadd.f32 %v90_v27, %v89_v31  ;;  %v40_v47 = vld [vmem:[%s793_s1 + $0xc0] sm:$0xff]  ;;  %v110_v49 = vadd.f32 %v109_v33, %v108_v39  ;;  %v128_v50 = vsel %vm84_vm1, %v33_v36, 0.0  ;;  %v41_v53 = vld [vmem:[%s793_s1 + $0xc8] sm:$0xff] }
   0x9   :  { %v130_v51 = vsel %vm84_vm1, %v34_v37, 0.0  ;;  %v36_v52 = vld [vmem:[%s793_s1 + $0xa0] sm:$0xff]  ;;  %v42_v54 = vld [vmem:[%s793_s1 + $0xd0] sm:$0xff]  ;;  %v113_v56 = vsel %vm84_vm1, %v28_v35, 0.0  ;;  %v129_v57 = vadd.f32 %v128_v50, %v127_v45  ;;  %v96_v59 = vsel %vm84_vm1, %v22_v40, 0.0  ;;  %v31_v63 = vld [vmem:[%s793_s1 + $0x78] sm:$0xff] }
   0xa   :  { %v93_v55 = vadd.f32 %v92_v38, %v91_v43  ;;  %v30_v58 = vld [vmem:[%s793_s1 + $0x70] sm:$0xff]  ;;  %v98_v60 = vsel %vm84_vm1, %v23_v41, 0.0  ;;  %v112_v61 = vadd.f32 %v111_v44, %v110_v49  ;;  %v132_v62 = vsel %vm84_vm1, %v35_v42, 0.0  ;;  %v37_v0 = vld [vmem:[%s793_s1 + $0xa8] sm:$0xff]  ;;  %v43_v1 = vld [vmem:[%s793_s1 + $0xd8] sm:$0xff] }
   0xb   :  { %v115_v3 = vsel %vm84_vm1, %v29_v46, 0.0  ;;  %v131_v4 = vadd.f32 %v130_v51, %v129_v57  ;;  %v148_v5 = vsel %vm84_vm1, %v40_v47, 0.0  ;;  %v38_v6 = vld [vmem:[%s793_s1 + $0xb0] sm:$0xff]  ;;  %v134_v8 = vsel %vm84_vm1, %v36_v52, 0.0  ;;  %v39_v11 = vld [vmem:[%s793_s1 + $0xb8] sm:$0xff]  ;;  %v44_v12 = vld [vmem:[%s793_s1 + $0xe0] sm:$0xff] }
   0xc   :  { %v95_v2 = vadd.f32 %v94_v48, %v93_v55  ;;  %v114_v7 = vadd.f32 %v113_v56, %v112_v61  ;;  %v149_v9 = vsel %vm84_vm1, %v41_v53, 0.0  ;;  %v151_v10 = vsel %vm84_vm1, %v42_v54, 0.0  ;;  %v48_v13 = vld [vmem:[%s793_s1 + $0x100] sm:$0xff]  ;;  %v49_v18 = vld [vmem:[%s793_s1 + $0x108] sm:$0xff]  ;;  %v50_v24 = vld [vmem:[%s793_s1 + $0x110] sm:$0xff] }
   0xd   :  { %v117_v15 = vsel %vm84_vm1, %v30_v58, 0.0  ;;  %v133_v16 = vadd.f32 %v132_v62, %v131_v4  ;;  %v150_v17 = vadd.f32 %v149_v9, %v148_v5  ;;  %v119_v20 = vsel %vm84_vm1, %v31_v63, 0.0  ;;  %v45_v23 = vld [vmem:[%s793_s1 + $0xe8] sm:$0xff]  ;;  %v51_v29 = vld [vmem:[%s793_s1 + $0x118] sm:$0xff]  ;;  %v46_v35 = vld [vmem:[%s793_s1 + $0xf0] sm:$0xff] }
   0xe   :  { %v97_v14 = vadd.f32 %v96_v59, %v95_v2  ;;  %v116_v19 = vadd.f32 %v115_v3, %v114_v7  ;;  %v136_v21 = vsel %vm84_vm1, %v37_v0, 0.0  ;;  %v153_v22 = vsel %vm84_vm1, %v43_v1, 0.0  ;;  %v47_v40 = vld [vmem:[%s793_s1 + $0xf8] sm:$0xff]  ;;  %v52_v41 = vld [vmem:[%s793_s1 + $0x120] sm:$0xff]  ;;  %v53_v46 = vld [vmem:[%s793_s1 + $0x128] sm:$0xff] }
   0xf   :  { %v135_v26 = vadd.f32 %v134_v8, %v133_v16  ;;  %v138_v27 = vsel %vm84_vm1, %v38_v6, 0.0  ;;  %v152_v28 = vadd.f32 %v151_v10, %v150_v17  ;;  %v140_v31 = vsel %vm84_vm1, %v39_v11, 0.0  ;;  %v56_v47 = vld [vmem:[%s793_s1 + $0x140] sm:$0xff]  ;;  %v57_v52 = vld [vmem:[%s793_s1 + $0x148] sm:$0xff]  ;;  %v58_v56 = vld [vmem:[%s793_s1 + $0x150] sm:$0xff] }
  0x10   :  { %v99_v25 = vadd.f32 %v98_v60, %v97_v14  ;;  %v118_v30 = vadd.f32 %v117_v15, %v116_v19  ;;  %v155_v32 = vsel %vm84_vm1, %v44_v12, 0.0  ;;  %v169_v33 = vsel %vm84_vm1, %v48_v13, 0.0 }
  0x11   :  { %v137_v37 = vadd.f32 %v136_v21, %v135_v26  ;;  %v154_v38 = vadd.f32 %v153_v22, %v152_v28  ;;  %v170_v39 = vsel %vm84_vm1, %v49_v18, 0.0  ;;  %v157_v43 = vsel %vm84_vm1, %v45_v23, 0.0 }
  0x12   :  { %v100_v36 = vrot.slane %v99_v25, 4  ;;  %v120_v42 = vadd.f32 %v119_v20, %v118_v30  ;;  %v171_v44 = vadd.f32 %v170_v39, %v169_v33  ;;  %v172_v45 = vsel %vm84_vm1, %v50_v24, 0.0 }
  0x13   :  { %v139_v49 = vadd.f32 %v138_v27, %v137_v37  ;;  %v156_v50 = vadd.f32 %v155_v32, %v154_v38  ;;  %v174_v51 = vsel %vm84_vm1, %v51_v29, 0.0  ;;  %v159_v54 = vsel %vm84_vm1, %v46_v35, 0.0 }
  0x14   :  { %v101_v48 = vadd.f32 %v100_v36, %v99_v25  ;;  %v121_v53 = vrot.slane %v120_v42, 4  ;;  %v173_v55 = vadd.f32 %v172_v45, %v171_v44  ;;  %v161_v59 = vsel %vm84_vm1, %v47_v40, 0.0 }
  0x15   :  { %v141_v57 = vadd.f32 %v140_v31, %v139_v49  ;;  %v158_v58 = vadd.f32 %v157_v43, %v156_v50  ;;  %v176_v60 = vsel %vm84_vm1, %v52_v41, 0.0 }
  0x16   :  { %9 = vsyncpa [#allocation4], 0  ;;  %v54_v61 = vld [vmem:[%s793_s1 + $0x130] sm:$0xff]  ;;  %v59_v62 = vld [vmem:[%s793_s1 + $0x158] sm:$0xff]  ;;  %v122_v63 = vadd.f32 %v121_v53, %v120_v42  ;;  %v175_v0 = vadd.f32 %v174_v51, %v173_v55  ;;  %v178_v1 = vsel %vm84_vm1, %v53_v46, 0.0  ;;  %v190_v2 = vsel %vm84_vm1, %v56_v47, 0.0 }
  0x17   :  { %v102_v3 = vrot.slane %v101_v48, 2  ;;  %v142_v4 = vrot.slane %v141_v57, 4  ;;  %v160_v5 = vadd.f32 %v159_v54, %v158_v58  ;;  %v191_v6 = vsel %vm84_vm1, %v57_v52, 0.0  ;;  %v55_v7 = vld [vmem:[%s793_s1 + $0x138] sm:$0xff]  ;;  %v60_v8 = vld [vmem:[%s793_s1 + $0x160] sm:$0xff]  ;;  %v61_v17 = vld [vmem:[%s793_s1 + $0x168] sm:$0xff] }
  0x18   :  { %v123_v9 = vrot.slane %v122_v63, 2  ;;  %v177_v10 = vadd.f32 %v176_v60, %v175_v0  ;;  %v192_v11 = vadd.f32 %v191_v6, %v190_v2  ;;  %v193_v12 = vsel %vm84_vm1, %v58_v56, 0.0  ;;  %v64_v18 = vld [vmem:[%s793_s1 + $0x180] sm:$0xff]  ;;  %v65_v21 = vld [vmem:[%s793_s1 + $0x188] sm:$0xff]  ;;  %v62_v25 = vld [vmem:[%s793_s1 + $0x170] sm:$0xff]  ;;  %s478_s9 = smov [#allocation3]  }
  0x19   :  { %v143_v13 = vadd.f32 %v142_v4, %v141_v57  ;;  %v162_v14 = vadd.f32 %v161_v59, %v160_v5  ;;  %v180_v15 = vsel %vm84_vm1, %v54_v61, 0.0  ;;  %v195_v16 = vsel %vm84_vm1, %v59_v62, 0.0  ;;  %v66_v26 = vld [vmem:[%s793_s1 + $0x190] sm:$0xff]  ;;  %v67_v31 = vld [vmem:[%s793_s1 + $0x198] sm:$0xff]  ;;  %v68_v41 = vld [vmem:[%s793_s1 + $0x1a0] sm:$0xff]  ;;  %s412_s10 = sshll.u32 %s478_s9, 4  ;;  %s413_s10 = int_to_ptr.vmem [resolvable:$true] %s412_s10 }
  0x1a   :  { %v179_v19 = vadd.f32 %v178_v1, %v177_v10  ;;  %v194_v20 = vadd.f32 %v193_v12, %v192_v11  ;;  %v182_v23 = vsel %vm84_vm1, %v55_v7, 0.0  ;;  %v197_v24 = vsel %vm84_vm1, %v60_v8, 0.0  ;;  %v63_v37 = vld [vmem:[%s793_s1 + $0x178] sm:$0xff]  ;;  %v69_v46 = vld [vmem:[%s793_s1 + $0x1a8] sm:$0xff]  ;;  %v72_v47 = vld [vmem:[%s793_s1 + $0x1c0] sm:$0xff]  ;;  %s451_s11 = scalar_lea.vmem %s413_s10, 128  ;;  %p456_p1 = scmp.lt.s32.totalorder %s413_s10, %s413_s10 }
  0x1b   :  { %v163_v22 = vrot.slane %v162_v14, 4  ;;  %v103_v27 = vadd.f32 %v102_v3, %v101_v48  ;;  %v124_v28 = vadd.f32 %v123_v9, %v122_v63  ;;  %v144_v32 = vrot.slane %v143_v13, 2  ;;  %v73_v48 = vld [vmem:[%s793_s1 + $0x1c8] sm:$0xff]  ;;  %v74_v53 = vld [vmem:[%s793_s1 + $0x1d0] sm:$0xff]  ;;  %v75_v58 = vld [vmem:[%s793_s1 + $0x1d8] sm:$0xff]  ;;  %p452_p0 = scmp.ne.s32.totalorder %s413_s10, %s451_s11  ;;  %p457_p2 = scmp.lt.s32.totalorder %s451_s11, %s451_s11 }
  0x1c   :  { %v181_v29 = vadd.f32 %v180_v15, %v179_v19  ;;  %v196_v30 = vadd.f32 %v195_v16, %v194_v20  ;;  %v199_v35 = vsel %vm84_vm1, %v61_v17, 0.0  ;;  %v211_v36 = vsel %vm84_vm1, %v64_v18, 0.0  ;;  %v70_v63 = vld [vmem:[%s793_s1 + $0x1b0] sm:$0xff]  ;;  %v76_v4 = vld [vmem:[%s793_s1 + $0x1e0] sm:$0xff]  ;;  %v71_v9 = vld [vmem:[%s793_s1 + $0x1b8] sm:$0xff] }
  0x1d   :  { %v164_v33 = vadd.f32 %v163_v22, %v162_v14  ;;  %v212_v40 = vsel %vm84_vm1, %v65_v21, 0.0  ;;  %v201_v43 = vsel %vm84_vm1, %v62_v25, 0.0  ;;  %v214_v45 = vsel %vm84_vm1, %v66_v26, 0.0  ;;  %v77_v14 = vld [vmem:[%s793_s1 + $0x1e8] sm:$0xff]  ;;  %v78_v22 = vld [vmem:[%s793_s1 + $0x1f0] sm:$0xff]  ;;  %p458_p3 = por %p457_p2, %p456_p1 }
  0x1e   :  { %v183_v38 = vadd.f32 %v182_v23, %v181_v29  ;;  %v198_v39 = vadd.f32 %v197_v24, %v196_v30  ;;  %v213_v44 = vadd.f32 %v212_v40, %v211_v36  ;;  %v104_v49 = vrot.slane %v103_v27, 1  ;;  %v79_v30 = vld [vmem:[%s793_s1 + $0x1f8] sm:$0xff] }
  0x1f   :  { %v165_v42 = vrot.slane %v164_v33, 2  ;;  %v216_v52 = vsel %vm84_vm1, %v67_v31, 0.0  ;;  %v125_v54 = vrot.slane %v124_v28, 1  ;;  %v145_v55 = vadd.f32 %v144_v32, %v143_v13  ;;  %p459_p4 = pnand %p458_p3, %p452_p0 }
  0x20   :  { %v184_v50 = vrot.slane %v183_v38, 4  ;;  %v200_v51 = vadd.f32 %v199_v35, %v198_v39  ;;  %v203_v56 = vsel %vm84_vm1, %v63_v37, 0.0  ;;  %v215_v57 = vadd.f32 %v214_v45, %v213_v44 }
  0x21   :  { %v166_v59 = vadd.f32 %v165_v42, %v164_v33  ;;  %v218_v62 = vsel %vm84_vm1, %v68_v41, 0.0  ;;  %v220_v1 = vsel %vm84_vm1, %v69_v46, 0.0  ;;  %v232_v2 = vsel %vm84_vm1, %v72_v47, 0.0 }
  0x22   :  { %v185_v60 = vadd.f32 %v184_v50, %v183_v38  ;;  %v202_v61 = vadd.f32 %v201_v43, %v200_v51  ;;  %v217_v0 = vadd.f32 %v216_v52, %v215_v57  ;;  %v233_v3 = vsel %vm84_vm1, %v73_v48, 0.0 }
  0x23   :  { %v234_v7 = vadd.f32 %v233_v3, %v232_v2  ;;  %v235_v8 = vsel %vm84_vm1, %v74_v53, 0.0  ;;  %v105_v10 = vadd.f32 %v104_v49, %v103_v27  ;;  %v146_v11 = vrot.slane %v145_v55, 1 }
  0x24   :  { %v186_v5 = vrot.slane %v185_v60, 2  ;;  %v204_v6 = vadd.f32 %v203_v56, %v202_v61  ;;  %v219_v12 = vadd.f32 %v218_v62, %v217_v0  ;;  %v237_v13 = vsel %vm84_vm1, %v75_v58, 0.0 }
  0x25   :  { %v126_v15 = vadd.f32 %v125_v54, %v124_v28  ;;  %v222_v17 = vsel %vm84_vm1, %v70_v63, 0.0  ;;  %v236_v18 = vadd.f32 %v235_v8, %v234_v7  ;;  %v239_v21 = vsel %vm84_vm1, %v76_v4, 0.0 }
  0x26   :  { %v205_v16 = vrot.slane %v204_v6, 4  ;;  %v187_v19 = vadd.f32 %v186_v5, %v185_v60  ;;  %v221_v20 = vadd.f32 %v220_v1, %v219_v12  ;;  %v167_v23 = vrot.slane %v166_v59, 1 }
  0x27   :  { %v224_v25 = vsel %vm84_vm1, %v71_v9, 0.0  ;;  %v238_v26 = vadd.f32 %v237_v13, %v236_v18  ;;  %v147_v27 = vadd.f32 %v146_v11, %v145_v55  ;;  %v241_v28 = vsel %vm84_vm1, %v77_v14, 0.0 }
  0x28   :  { %v206_v24 = vadd.f32 %v205_v16, %v204_v6  ;;  %v223_v29 = vadd.f32 %v222_v17, %v221_v20  ;;  %v254_v33 = vmul.f32 0.015625, %v105_v10  ;;  %v255_v35 = vmul.f32 0.015625, %v126_v15 }
  0x29   :  { %v240_v32 = vadd.f32 %v239_v21, %v238_v26  ;;  %v188_v36 = vrot.slane %v187_v19, 1  ;;  %v243_v38 = vsel %vm84_vm1, %v78_v22, 0.0  ;;  %vm270_vm2 = vcmask 1041409  }
  0x2a   :  { %v207_v31 = vrot.slane %v206_v24, 2  ;;  %v225_v37 = vadd.f32 %v224_v25, %v223_v29  ;;  %v168_v39 = vadd.f32 %v167_v23, %v166_v59  ;;  %v245_v43 = vsel %vm84_vm1, %v79_v30, 0.0 }
  0x2b   :  { %v242_v41 = vadd.f32 %v241_v28, %v240_v32  ;;  %v256_v44 = vmul.f32 0.015625, %v147_v27  ;;  %vm272_vm3 = vcmask 1042434   ;;  %v271_v47 = vsel %vm270_vm2, %v255_v35, %v254_v33 }
  0x2c   :  { %v208_v40 = vadd.f32 %v207_v31, %v206_v24  ;;  %v226_v42 = vrot.slane %v225_v37, 4  ;;  %v356_v48 = vmul.f32 %v254_v33, %v254_v33  ;;  %v189_v49 = vadd.f32 %v188_v36, %v187_v19 }
  0x2d   :  { %v244_v46 = vadd.f32 %v243_v38, %v242_v41  ;;  %v357_v51 = vmul.f32 %v255_v35, %v255_v35  ;;  %v358_v52 = vmul.f32 %v256_v44, %v256_v44  ;;  %v257_v54 = vmul.f32 0.015625, %v168_v39 }
  0x2e   :  { %v209_v45 = vrot.slane %v208_v40, 1  ;;  %v227_v50 = vadd.f32 %v226_v42, %v225_v37  ;;  %v273_v56 = vsel %vm272_vm3, %v256_v44, %v271_v47  ;;  %vm274_vm4 = vcmask 1043459  }
  0x2f   :  { %v246_v53 = vadd.f32 %v245_v43, %v244_v46  ;;  %v372_v57 = vsel %vm270_vm2, %v357_v51, %v356_v48  ;;  %v359_v60 = vmul.f32 %v257_v54, %v257_v54  ;;  %v258_v62 = vmul.f32 0.015625, %v189_v49 }
  0x30   :  { %v228_v55 = vrot.slane %v227_v50, 2  ;;  %v210_v58 = vadd.f32 %v209_v45, %v208_v40  ;;  %v373_v63 = vsel %vm272_vm3, %v358_v52, %v372_v57  ;;  %v275_v1 = vsel %vm274_vm4, %v257_v54, %v273_v56 }
  0x31   :  { %v247_v59 = vrot.slane %v246_v53, 4  ;;  %vm276_vm5 = vcmask 1044484   ;;  %v360_v3 = vmul.f32 %v258_v62, %v258_v62  ;;  %v374_v6 = vsel %vm274_vm4, %v359_v60, %v373_v63 }
  0x32   :  { %v229_v61 = vadd.f32 %v228_v55, %v227_v50  ;;  %v259_v5 = vmul.f32 0.015625, %v210_v58  ;;  %v277_v8 = vsel %vm276_vm5, %v258_v62, %v275_v1  ;;  %vm278_vm6 = vcmask 1045509  }
  0x33   :  { %v248_v0 = vadd.f32 %v247_v59, %v246_v53  ;;  %v375_v12 = vsel %vm276_vm5, %v360_v3, %v374_v6  ;;  %vm280_vm7 = vcmask 1046534   ;;  %vm282_vm8 = vcmask 1047559  }
  0x34   :  { %v230_v2 = vrot.slane %v229_v61, 1  ;;  %v361_v10 = vmul.f32 %v259_v5, %v259_v5  ;;  %v279_v14 = vsel %vm278_vm6, %v259_v5, %v277_v8  ;;  %v390_v25 = vrot.slane %v551_v34, 4 }
  0x35   :  { %v249_v4 = vrot.slane %v248_v0, 2  ;;  %v399_v36 = vstv %s792_s0 }
  0x36   :  { %v231_v7 = vadd.f32 %v230_v2, %v229_v61  ;;  %v376_v17 = vsel %vm278_vm6, %v361_v10, %v375_v12  ;;  %v391_v26 = vadd.f32 %v390_v25, %v551_v34 }
  0x37   :  { %v250_v9 = vadd.f32 %v249_v4, %v248_v0 }
  0x38   :  { %v260_v11 = vmul.f32 0.015625, %v231_v7  ;;  %v392_v27 = vrot.slane %v391_v26, 2 }
  0x39   :  { %v251_v13 = vrot.slane %v250_v9, 1 }
  0x3a   :  { %v362_v15 = vmul.f32 %v260_v11, %v260_v11  ;;  %v281_v18 = vsel %vm280_vm7, %v260_v11, %v279_v14  ;;  %v393_v29 = vadd.f32 %v392_v27, %v391_v26 }
  0x3b   :  { %v252_v16 = vadd.f32 %v251_v13, %v250_v9 }
  0x3c   :  { %v377_v20 = vsel %vm280_vm7, %v362_v15, %v376_v17  ;;  %v394_v30 = vrot.slane %v393_v29, 1 }
  0x3d   :  { %v261_v19 = vmul.f32 0.015625, %v252_v16 }
  0x3e   :  { %v395_v32 = vadd.f32 %v394_v30, %v393_v29 }
  0x3f   :  { %v283_v21 = vsel %vm282_vm8, %v261_v19, %v281_v18  ;;  %v363_v22 = vmul.f32 %v261_v19, %v261_v19 }
  0x40   :  { %435 = vmatmul.mubr.msk.f32.vlgmr.msra.gmra.mrb[0].mxu0 %vm84_vm1, %v283_v21  ;;  %v401_v33 = vmax.f32 %v395_v32, 1e-24 }
  0x41   :  { %v378_v23 = vsel %vm282_vm8, %v363_v22, %v377_v20 }
  0x42   :  { %v380_v24 = vsel %vm84_vm1, %v378_v23, 0.0 }
  0x43   :  { %381 = vadd.xlane.f32.xlu0 %v380_v24 }
  0xd0   :  { %v382_v28 = vpop.xlane.xlu0 %381 }
  0xd1   :  { %v397_v31 = vmax.f32 %v382_v28, 1e-24 }
  0xd3   :  { %447 = vrsqrt.f32 %v397_v31 }
  0xd4   :  { %449 = vrsqrt.f32 %v401_v33 }
  0xdd   :  { %v448_v35 = vpop.eup %447 }
  0xde   :  { %v400_v37 = vmul.f32 %v448_v35, %v399_v36  ;;  %v450_v38 = vpop.eup %449 }
 0x113   :  { %v352_v39 = vpop.f32.mrb[0].mxu0 }
 0x114   :  { %v403_v34 = vmul.f32 %v400_v37, %v352_v39  ;;  %v436_v40 = vpop.f32.mrb[1].mxu0 }
 0x116   :  { %v404_v41 = vmul.f32 %v450_v38, %v403_v34 }
 0x118   :  { %405 = vst [vmem:[#allocation3] sm:$0xff] %v404_v41 }
 0x119   :  { %462 = shalt.err (!%p459_p4)
}
 0x11a   :  { %s463_s0 = scalar_lea.hbm %s795_s3, 128 }
 0x11b   :  { %p464_p5 = scmp.ne.s32.totalorder %s795_s3, %s463_s0  ;;  %p467_p6 = scmp.lt.u32.totalorder %s463_s0, %s795_s3 }
 0x11d   :  { %p469_p7 = pnand %p467_p6, %p464_p5 }
 0x11f   :  { %472 = shalt.err (!%p469_p7)
}
 0x120   :  { %415 = dma.vmem_to_hbm [thread:$0]  %s413_s10, 128, %s795_s3, [#allocation4]  }
 0x121   :  { %473 = dma.done.wait [#allocation4], 128  }
 0x122   :  { %474 = vsyncadd [#allocation4], 4294967168 }
 0x123   :  { %419 = vsyncpa [#allocation4], 1 }

</bundles_post_ra>
